<compile_context>
chip_gen: v6e
topology: v6e:2x2x1
jax: 0.10.0
libtpu: 0.0.40
codegen_flags: <defaults>
</compile_context>

<pallas_src>
import jax
import jax.numpy as jnp
from jax.experimental import pallas as pl
from jax.experimental.pallas import tpu as pltpu

HIDDEN = 256
BN_EPS = 1e-5
LANE = 128


def _round_up(n, m):
    return ((n + m - 1) // m) * m


def _wgan_gen_kernel(
    x_ref,
    w1_ref, b1_ref, g1_ref, be1_ref,
    w2_ref, b2_ref, g2_ref, be2_ref,
    w3_ref, b3_ref, g3_ref, be3_ref,
    w4_ref, b4_ref,
    out_ref,
):
    def linear(h, w_ref, b_ref):
        # bf16 operands into the MXU, f32 accumulation, f32 bias add.
        return (
            jnp.dot(h.astype(jnp.bfloat16), w_ref[...],
                    preferred_element_type=jnp.float32)
            + b_ref[...]
        )

    def batchnorm(h, g_ref, be_ref):
        # Training-mode BatchNorm1d with full-batch biased statistics.
        # One-pass stats + fused affine: h * s + t.
        mean = jnp.mean(h, axis=0, keepdims=True)
        mean_sq = jnp.mean(h * h, axis=0, keepdims=True)
        var = mean_sq - mean * mean
        s = g_ref[...] * jax.lax.rsqrt(var + BN_EPS)
        t = be_ref[...] - mean * s
        return h * s + t

    x = x_ref[...]                                    # (B, latent_pad) bf16

    h = linear(x, w1_ref, b1_ref)
    h = jnp.maximum(batchnorm(h, g1_ref, be1_ref), 0.0)

    h = linear(h, w2_ref, b2_ref)
    h = jnp.maximum(batchnorm(h, g2_ref, be2_ref), 0.0)

    h = linear(h, w3_ref, b3_ref)
    h = batchnorm(h, g3_ref, be3_ref)                 # no ReLU after 3rd BN

    out_ref[...] = linear(h, w4_ref, b4_ref).astype(out_ref.dtype)


def wgan_gen_forward(x, params):
    """x: (B, latent_dim) float32. params: dict of f32 weights (see init_params)."""
    B, latent_dim = x.shape
    input_dim = params["b4"].shape[1]
    latent_pad = _round_up(latent_dim, LANE)
    out_pad = _round_up(input_dim, LANE)

    def pad_cols(a, n):
        p = n - a.shape[1]
        return a if p == 0 else jnp.pad(a, ((0, 0), (0, p)))

    def pad_rows(a, n):
        p = n - a.shape[0]
        return a if p == 0 else jnp.pad(a, ((0, p), (0, 0)))

    # Lane-dense bf16 input (zero rows in w1 keep the math identical).
    x_p = pad_cols(x, latent_pad).astype(jnp.bfloat16)

    w1 = pad_rows(params["w1"], latent_pad).astype(jnp.bfloat16)
    w2 = params["w2"].astype(jnp.bfloat16)
    w3 = params["w3"].astype(jnp.bfloat16)
    w4 = pad_cols(params["w4"], out_pad).astype(jnp.bfloat16)
    b4 = pad_cols(params["b4"], out_pad)

    args = (
        x_p,
        w1, params["b1"], params["g1"], params["be1"],
        w2, params["b2"], params["g2"], params["be2"],
        w3, params["b3"], params["g3"], params["be3"],
        w4, b4,
    )

    mxu_elems = latent_pad * HIDDEN + 2 * HIDDEN * HIDDEN + HIDDEN * out_pad
    flops = 2 * B * mxu_elems
    weight_bytes = 2 * mxu_elems + 4 * (7 * HIDDEN + out_pad)
    bytes_accessed = B * latent_pad * 2 + B * out_pad * 4 + weight_bytes

    vmem = pl.BlockSpec(memory_space=pltpu.MemorySpace.VMEM)
    out_p = pl.pallas_call(
        _wgan_gen_kernel,
        out_shape=jax.ShapeDtypeStruct((B, out_pad), jnp.float32),
        in_specs=[vmem] * len(args),
        out_specs=vmem,
        cost_estimate=pl.CostEstimate(
            flops=flops,
            transcendentals=3 * HIDDEN,
            bytes_accessed=bytes_accessed,
        ),
        compiler_params=pltpu.CompilerParams(
            vmem_limit_bytes=48 * 1024 * 1024,
        ),
    )(*args)
    return out_p[:, :input_dim]


def init_params(key, latent_dim, input_dim):
    """Deterministic synthetic parameters (PyTorch-shaped, pre-transposed, f32)."""
    ks = jax.random.split(key, 8)

    def lin(kw, kb, fan_in, fan_out):
        bound = 1.0 / (fan_in ** 0.5)
        w = jax.random.uniform(kw, (fan_in, fan_out), jnp.float32, -bound, bound)
        b = jax.random.uniform(kb, (1, fan_out), jnp.float32, -bound, bound)
        return w, b

    w1, b1 = lin(ks[0], ks[1], latent_dim, HIDDEN)
    w2, b2 = lin(ks[2], ks[3], HIDDEN, HIDDEN)
    w3, b3 = lin(ks[4], ks[5], HIDDEN, HIDDEN)
    w4, b4 = lin(ks[6], ks[7], HIDDEN, input_dim)

    ones = jnp.ones((1, HIDDEN), jnp.float32)
    zeros = jnp.zeros((1, HIDDEN), jnp.float32)
    return dict(
        w1=w1, b1=b1, g1=ones, be1=zeros,
        w2=w2, b2=b2, g2=ones, be2=zeros,
        w3=w3, b3=b3, g3=ones, be3=zeros,
        w4=w4, b4=b4,
    )


def _reference_bf16(x, p):
    """Pure-JAX reference mirroring the kernel's bf16-matmul / f32-BN math."""
    def mm(a, w):
        return jnp.dot(a.astype(jnp.bfloat16), w.astype(jnp.bfloat16),
                       preferred_element_type=jnp.float32)

    def bn(h, g, be):
        m = jnp.mean(h, axis=0, keepdims=True)
        v = jnp.mean(h * h, axis=0, keepdims=True) - m * m
        s = g * jax.lax.rsqrt(v + BN_EPS)
        return h * s + (be - m * s)

    h = mm(x, p["w1"]) + p["b1"]
    h = jnp.maximum(bn(h, p["g1"], p["be1"]), 0.0)
    h = mm(h, p["w2"]) + p["b2"]
    h = jnp.maximum(bn(h, p["g2"], p["be2"]), 0.0)
    h = mm(h, p["w3"]) + p["b3"]
    h = bn(h, p["g3"], p["be3"])
    return mm(h, p["w4"]) + p["b4"]


def _reference_f32(x, p):
    """Full-precision reference (loose check against bf16 kernel)."""
    def bn(h, g, be):
        m = jnp.mean(h, axis=0, keepdims=True)
        v = jnp.mean((h - m) ** 2, axis=0, keepdims=True)
        return (h - m) / jnp.sqrt(v + BN_EPS) * g + be

    h = x @ p["w1"] + p["b1"]
    h = jnp.maximum(bn(h, p["g1"], p["be1"]), 0.0)
    h = h @ p["w2"] + p["b2"]
    h = jnp.maximum(bn(h, p["g2"], p["be2"]), 0.0)
    h = h @ p["w3"] + p["b3"]
    h = bn(h, p["g3"], p["be3"])
    return h @ p["w4"] + p["b4"]


if __name__ == "__main__":
    key = jax.random.PRNGKey(0)
    k_x, k_p = jax.random.split(key)

    batch = 8
    latent_dim = 32
    input_dim = 16

    x = jax.random.normal(k_x, (batch, latent_dim), jnp.float32)
    params = init_params(k_p, latent_dim, input_dim)

    out = wgan_gen_forward(x, params)
    out = jax.block_until_ready(out)

    assert out.shape == (batch, input_dim)

    ref_bf16 = _reference_bf16(x, params)
    assert jnp.allclose(out, ref_bf16, atol=2e-3, rtol=2e-3), (
        float(jnp.max(jnp.abs(out - ref_bf16))))

    ref_f32 = _reference_f32(x, params)
    assert jnp.allclose(out, ref_f32, atol=5e-2, rtol=5e-2), (
        float(jnp.max(jnp.abs(out - ref_f32))))

    print("KERNEL_OK")
</pallas_src>

<mosaic_0001>
module attributes {stable_mosaic.version = 11 : i64} {
  func.func @_wgan_gen_kernel(%arg0: memref<8x128xbf16, #tpu.memory_space<vmem>>, %arg1: memref<128x256xbf16, #tpu.memory_space<vmem>>, %arg2: memref<1x256xf32, #tpu.memory_space<vmem>>, %arg3: memref<1x256xf32, #tpu.memory_space<vmem>>, %arg4: memref<1x256xf32, #tpu.memory_space<vmem>>, %arg5: memref<256x256xbf16, #tpu.memory_space<vmem>>, %arg6: memref<1x256xf32, #tpu.memory_space<vmem>>, %arg7: memref<1x256xf32, #tpu.memory_space<vmem>>, %arg8: memref<1x256xf32, #tpu.memory_space<vmem>>, %arg9: memref<256x256xbf16, #tpu.memory_space<vmem>>, %arg10: memref<1x256xf32, #tpu.memory_space<vmem>>, %arg11: memref<1x256xf32, #tpu.memory_space<vmem>>, %arg12: memref<1x256xf32, #tpu.memory_space<vmem>>, %arg13: memref<256x128xbf16, #tpu.memory_space<vmem>>, %arg14: memref<1x128xf32, #tpu.memory_space<vmem>>, %arg15: memref<8x128xf32, #tpu.memory_space<vmem>>) attributes {dimension_semantics = [], scalar_prefetch = 0 : i64, scratch_operands = 0 : i64, tpu.core_type = #tpu.core_type<tc>} {
    %c0 = arith.constant 0 : index
    %c0_0 = arith.constant 0 : index
    %0 = vector.load %arg0[%c0, %c0_0] : memref<8x128xbf16, #tpu.memory_space<vmem>>, vector<8x128xbf16>
    %c0_1 = arith.constant 0 : index
    %c0_2 = arith.constant 0 : index
    %1 = vector.load %arg1[%c0_1, %c0_2] : memref<128x256xbf16, #tpu.memory_space<vmem>>, vector<128x256xbf16>
    %cst = arith.constant dense<0.000000e+00> : vector<8x256xf32>
    %2 = tpu.matmul %0, %1, %cst {dimension_numbers = #tpu.dot_dimension_numbers<[1], [0], [0], [1], [0, 0, 1, 1], [], []>} : vector<8x128xbf16>, vector<128x256xbf16>, vector<8x256xf32> -> vector<8x256xf32>
    %c0_3 = arith.constant 0 : index
    %c0_4 = arith.constant 0 : index
    %3 = vector.load %arg2[%c0_3, %c0_4] : memref<1x256xf32, #tpu.memory_space<vmem>>, vector<1x256xf32>
    %4 = vector.broadcast %3 : vector<1x256xf32> to vector<8x256xf32>
    %5 = arith.addf %2, %4 : vector<8x256xf32>
    %cst_5 = arith.constant dense<0.000000e+00> : vector<256xf32>
    %6 = vector.multi_reduction <add>, %5, %cst_5 [0] : vector<8x256xf32> to vector<256xf32>
    %7 = vector.shape_cast %6 : vector<256xf32> to vector<1x256xf32>
    %cst_6 = arith.constant 8.000000e+00 : f32
    %8 = vector.broadcast %cst_6 : f32 to vector<1x256xf32>
    %9 = arith.divf %7, %8 : vector<1x256xf32>
    %10 = arith.mulf %5, %5 : vector<8x256xf32>
    %cst_7 = arith.constant dense<0.000000e+00> : vector<256xf32>
    %11 = vector.multi_reduction <add>, %10, %cst_7 [0] : vector<8x256xf32> to vector<256xf32>
    %12 = vector.shape_cast %11 : vector<256xf32> to vector<1x256xf32>
    %cst_8 = arith.constant 8.000000e+00 : f32
    %13 = vector.broadcast %cst_8 : f32 to vector<1x256xf32>
    %14 = arith.divf %12, %13 : vector<1x256xf32>
    %15 = arith.mulf %9, %9 : vector<1x256xf32>
    %16 = arith.subf %14, %15 : vector<1x256xf32>
    %c0_9 = arith.constant 0 : index
    %c0_10 = arith.constant 0 : index
    %17 = vector.load %arg3[%c0_9, %c0_10] : memref<1x256xf32, #tpu.memory_space<vmem>>, vector<1x256xf32>
    %cst_11 = arith.constant 9.99999974E-6 : f32
    %18 = vector.broadcast %cst_11 : f32 to vector<1x256xf32>
    %19 = arith.addf %16, %18 : vector<1x256xf32>
    %20 = math.rsqrt %19 : vector<1x256xf32>
    %21 = arith.mulf %17, %20 : vector<1x256xf32>
    %c0_12 = arith.constant 0 : index
    %c0_13 = arith.constant 0 : index
    %22 = vector.load %arg4[%c0_12, %c0_13] : memref<1x256xf32, #tpu.memory_space<vmem>>, vector<1x256xf32>
    %23 = arith.mulf %9, %21 : vector<1x256xf32>
    %24 = arith.subf %22, %23 : vector<1x256xf32>
    %25 = vector.broadcast %21 : vector<1x256xf32> to vector<8x256xf32>
    %26 = arith.mulf %5, %25 : vector<8x256xf32>
    %27 = vector.broadcast %24 : vector<1x256xf32> to vector<8x256xf32>
    %28 = arith.addf %26, %27 : vector<8x256xf32>
    %cst_14 = arith.constant 0.000000e+00 : f32
    %29 = vector.broadcast %cst_14 : f32 to vector<8x256xf32>
    %30 = arith.maximumf %28, %29 : vector<8x256xf32>
    %31 = arith.truncf %30 : vector<8x256xf32> to vector<8x256xbf16>
    %c0_15 = arith.constant 0 : index
    %c0_16 = arith.constant 0 : index
    %32 = vector.load %arg5[%c0_15, %c0_16] : memref<256x256xbf16, #tpu.memory_space<vmem>>, vector<256x256xbf16>
    %cst_17 = arith.constant dense<0.000000e+00> : vector<8x256xf32>
    %33 = tpu.matmul %31, %32, %cst_17 {dimension_numbers = #tpu.dot_dimension_numbers<[1], [0], [0], [1], [0, 0, 1, 1], [], []>} : vector<8x256xbf16>, vector<256x256xbf16>, vector<8x256xf32> -> vector<8x256xf32>
    %c0_18 = arith.constant 0 : index
    %c0_19 = arith.constant 0 : index
    %34 = vector.load %arg6[%c0_18, %c0_19] : memref<1x256xf32, #tpu.memory_space<vmem>>, vector<1x256xf32>
    %35 = vector.broadcast %34 : vector<1x256xf32> to vector<8x256xf32>
    %36 = arith.addf %33, %35 : vector<8x256xf32>
    %cst_20 = arith.constant dense<0.000000e+00> : vector<256xf32>
    %37 = vector.multi_reduction <add>, %36, %cst_20 [0] : vector<8x256xf32> to vector<256xf32>
    %38 = vector.shape_cast %37 : vector<256xf32> to vector<1x256xf32>
    %cst_21 = arith.constant 8.000000e+00 : f32
    %39 = vector.broadcast %cst_21 : f32 to vector<1x256xf32>
    %40 = arith.divf %38, %39 : vector<1x256xf32>
    %41 = arith.mulf %36, %36 : vector<8x256xf32>
    %cst_22 = arith.constant dense<0.000000e+00> : vector<256xf32>
    %42 = vector.multi_reduction <add>, %41, %cst_22 [0] : vector<8x256xf32> to vector<256xf32>
    %43 = vector.shape_cast %42 : vector<256xf32> to vector<1x256xf32>
    %cst_23 = arith.constant 8.000000e+00 : f32
    %44 = vector.broadcast %cst_23 : f32 to vector<1x256xf32>
    %45 = arith.divf %43, %44 : vector<1x256xf32>
    %46 = arith.mulf %40, %40 : vector<1x256xf32>
    %47 = arith.subf %45, %46 : vector<1x256xf32>
    %c0_24 = arith.constant 0 : index
    %c0_25 = arith.constant 0 : index
    %48 = vector.load %arg7[%c0_24, %c0_25] : memref<1x256xf32, #tpu.memory_space<vmem>>, vector<1x256xf32>
    %cst_26 = arith.constant 9.99999974E-6 : f32
    %49 = vector.broadcast %cst_26 : f32 to vector<1x256xf32>
    %50 = arith.addf %47, %49 : vector<1x256xf32>
    %51 = math.rsqrt %50 : vector<1x256xf32>
    %52 = arith.mulf %48, %51 : vector<1x256xf32>
    %c0_27 = arith.constant 0 : index
    %c0_28 = arith.constant 0 : index
    %53 = vector.load %arg8[%c0_27, %c0_28] : memref<1x256xf32, #tpu.memory_space<vmem>>, vector<1x256xf32>
    %54 = arith.mulf %40, %52 : vector<1x256xf32>
    %55 = arith.subf %53, %54 : vector<1x256xf32>
    %56 = vector.broadcast %52 : vector<1x256xf32> to vector<8x256xf32>
    %57 = arith.mulf %36, %56 : vector<8x256xf32>
    %58 = vector.broadcast %55 : vector<1x256xf32> to vector<8x256xf32>
    %59 = arith.addf %57, %58 : vector<8x256xf32>
    %cst_29 = arith.constant 0.000000e+00 : f32
    %60 = vector.broadcast %cst_29 : f32 to vector<8x256xf32>
    %61 = arith.maximumf %59, %60 : vector<8x256xf32>
    %62 = arith.truncf %61 : vector<8x256xf32> to vector<8x256xbf16>
    %c0_30 = arith.constant 0 : index
    %c0_31 = arith.constant 0 : index
    %63 = vector.load %arg9[%c0_30, %c0_31] : memref<256x256xbf16, #tpu.memory_space<vmem>>, vector<256x256xbf16>
    %cst_32 = arith.constant dense<0.000000e+00> : vector<8x256xf32>
    %64 = tpu.matmul %62, %63, %cst_32 {dimension_numbers = #tpu.dot_dimension_numbers<[1], [0], [0], [1], [0, 0, 1, 1], [], []>} : vector<8x256xbf16>, vector<256x256xbf16>, vector<8x256xf32> -> vector<8x256xf32>
    %c0_33 = arith.constant 0 : index
    %c0_34 = arith.constant 0 : index
    %65 = vector.load %arg10[%c0_33, %c0_34] : memref<1x256xf32, #tpu.memory_space<vmem>>, vector<1x256xf32>
    %66 = vector.broadcast %65 : vector<1x256xf32> to vector<8x256xf32>
    %67 = arith.addf %64, %66 : vector<8x256xf32>
    %cst_35 = arith.constant dense<0.000000e+00> : vector<256xf32>
    %68 = vector.multi_reduction <add>, %67, %cst_35 [0] : vector<8x256xf32> to vector<256xf32>
    %69 = vector.shape_cast %68 : vector<256xf32> to vector<1x256xf32>
    %cst_36 = arith.constant 8.000000e+00 : f32
    %70 = vector.broadcast %cst_36 : f32 to vector<1x256xf32>
    %71 = arith.divf %69, %70 : vector<1x256xf32>
    %72 = arith.mulf %67, %67 : vector<8x256xf32>
    %cst_37 = arith.constant dense<0.000000e+00> : vector<256xf32>
    %73 = vector.multi_reduction <add>, %72, %cst_37 [0] : vector<8x256xf32> to vector<256xf32>
    %74 = vector.shape_cast %73 : vector<256xf32> to vector<1x256xf32>
    %cst_38 = arith.constant 8.000000e+00 : f32
    %75 = vector.broadcast %cst_38 : f32 to vector<1x256xf32>
    %76 = arith.divf %74, %75 : vector<1x256xf32>
    %77 = arith.mulf %71, %71 : vector<1x256xf32>
    %78 = arith.subf %76, %77 : vector<1x256xf32>
    %c0_39 = arith.constant 0 : index
    %c0_40 = arith.constant 0 : index
    %79 = vector.load %arg11[%c0_39, %c0_40] : memref<1x256xf32, #tpu.memory_space<vmem>>, vector<1x256xf32>
    %cst_41 = arith.constant 9.99999974E-6 : f32
    %80 = vector.broadcast %cst_41 : f32 to vector<1x256xf32>
    %81 = arith.addf %78, %80 : vector<1x256xf32>
    %82 = math.rsqrt %81 : vector<1x256xf32>
    %83 = arith.mulf %79, %82 : vector<1x256xf32>
    %c0_42 = arith.constant 0 : index
    %c0_43 = arith.constant 0 : index
    %84 = vector.load %arg12[%c0_42, %c0_43] : memref<1x256xf32, #tpu.memory_space<vmem>>, vector<1x256xf32>
    %85 = arith.mulf %71, %83 : vector<1x256xf32>
    %86 = arith.subf %84, %85 : vector<1x256xf32>
    %87 = vector.broadcast %83 : vector<1x256xf32> to vector<8x256xf32>
    %88 = arith.mulf %67, %87 : vector<8x256xf32>
    %89 = vector.broadcast %86 : vector<1x256xf32> to vector<8x256xf32>
    %90 = arith.addf %88, %89 : vector<8x256xf32>
    %91 = arith.truncf %90 : vector<8x256xf32> to vector<8x256xbf16>
    %c0_44 = arith.constant 0 : index
    %c0_45 = arith.constant 0 : index
    %92 = vector.load %arg13[%c0_44, %c0_45] : memref<256x128xbf16, #tpu.memory_space<vmem>>, vector<256x128xbf16>
    %cst_46 = arith.constant dense<0.000000e+00> : vector<8x128xf32>
    %93 = tpu.matmul %91, %92, %cst_46 {dimension_numbers = #tpu.dot_dimension_numbers<[1], [0], [0], [1], [0, 0, 1, 1], [], []>} : vector<8x256xbf16>, vector<256x128xbf16>, vector<8x128xf32> -> vector<8x128xf32>
    %c0_47 = arith.constant 0 : index
    %c0_48 = arith.constant 0 : index
    %94 = vector.load %arg14[%c0_47, %c0_48] : memref<1x128xf32, #tpu.memory_space<vmem>>, vector<1x128xf32>
    %95 = vector.broadcast %94 : vector<1x128xf32> to vector<8x128xf32>
    %96 = arith.addf %93, %95 : vector<8x128xf32>
    %c0_49 = arith.constant 0 : index
    %c0_50 = arith.constant 0 : index
    %97 = vector.load %arg15[%c0_49, %c0_50] : memref<8x128xf32, #tpu.memory_space<vmem>>, vector<8x128xf32>
    tpu.vector_store %arg15[%c0_49, %c0_50], %96 {strides = array<i32>} : memref<8x128xf32, #tpu.memory_space<vmem>>, vector<8x128xf32>,
    return
  }
}

</mosaic_0001>

<bundles_post_ra>
// kernel: tpu_custom_call.1
= control target key start
LH: loop header
LB: loop body
LE: loop exit
PB: predicated region body
PF: predicated region fallthrough
CT: control target
= control target key end

     0   :  { %20 = vsyncpa [#allocation3], 0  ;;  %s1879_s0 = inlined_call_operand.hbm [shape: bf16[8,128], index: 0, kind: input, shape index: {}]   ;;  %s1880_s1 = inlined_call_operand.hbm [shape: bf16[128,256], index: 1, kind: input, shape index: {}]   ;;  %s1881_s2 = inlined_call_operand.vmem [shape: f32[1,256], index: 2, kind: input, shape index: {}]   ;;  %s1882_s3 = inlined_call_operand.vmem [shape: f32[1,256], index: 3, kind: input, shape index: {}]   ;;  %s1883_s4 = inlined_call_operand.vmem [shape: f32[1,256], index: 4, kind: input, shape index: {}]   ;;  %s1884_s5 = inlined_call_operand.hbm [shape: bf16[256,256], index: 5, kind: input, shape index: {}]   ;;  %s1885_s6 = inlined_call_operand.vmem [shape: f32[1,256], index: 6, kind: input, shape index: {}]   ;;  %s1886_s7 = inlined_call_operand.vmem [shape: f32[1,256], index: 7, kind: input, shape index: {}]   ;;  %s1887_s8 = inlined_call_operand.vmem [shape: f32[1,256], index: 8, kind: input, shape index: {}]   ;;  %s1888_s9 = inlined_call_operand.hbm [shape: bf16[256,256], index: 9, kind: input, shape index: {}]   ;;  %s1889_s10 = inlined_call_operand.vmem [shape: f32[1,256], index: 10, kind: input, shape index: {}]   ;;  %s1890_s11 = inlined_call_operand.vmem [shape: f32[1,256], index: 11, kind: input, shape index: {}]   ;;  %s1891_s12 = inlined_call_operand.vmem [shape: f32[1,256], index: 12, kind: input, shape index: {}]   ;;  %s1892_s13 = inlined_call_operand.hbm [shape: bf16[256,128], index: 13, kind: input, shape index: {}]   ;;  %s1893_s14 = inlined_call_operand.vmem [shape: f32[1,128], index: 14, kind: input, shape index: {}]   ;;  %s1894_s15 = inlined_call_operand.hbm [shape: f32[8,128], index: 15, kind: output, shape index: {}]  }
   0x1   :  { %21 = vsyncpa [#allocation6], 0 }
   0x2   :  { %22 = vsyncpa [#allocation9], 0 }
   0x3   :  { %23 = vsyncpa [#allocation4], 0  ;;  %s1687_s18 = smov [#allocation5]  }
   0x4   :  { %s39_s19 = sshll.u32 %s1687_s18, 4  ;;  %s40_s19 = int_to_ptr.vmem [resolvable:$true] %s39_s19 }
   0x5   :  { %s1567_s20 = scalar_lea.vmem %s40_s19, 2048  ;;  %p1572_p1 = scmp.lt.s32.totalorder %s40_s19, %s40_s19 }
   0x6   :  { %p1568_p0 = scmp.ne.s32.totalorder %s40_s19, %s1567_s20  ;;  %p1573_p2 = scmp.lt.s32.totalorder %s1567_s20, %s1567_s20 }
   0x8   :  { %p1574_p3 = por %p1573_p2, %p1572_p1 }
   0xa   :  { %p1575_p4 = pnand %p1574_p3, %p1568_p0 }
   0xc   :  { %1578 = shalt.err (!%p1575_p4)
}
   0xd   :  { %s1688_s21 = smov 128   ;;  %s1689_s22 = smov 8  }
   0xe   :  { %45 = dma.hbm_to_vmem [thread:$0]  %s1880_s1, 2048, %s40_s19, [#allocation6], %s1688_s21, %s1688_s21, %s1689_s22  }
   0xf   :  { %s1690_s25 = smov [#allocation8]   ;;  %s1691_s27 = smov [#allocation2]  }
  0x10   :  { %s75_s26 = sshll.u32 %s1690_s25, 4  ;;  %s30_s28 = sshll.u32 %s1691_s27, 4  ;;  %s76_s26 = int_to_ptr.vmem [resolvable:$true] %s75_s26  ;;  %s31_s28 = int_to_ptr.vmem [resolvable:$true] %s30_s28 }
  0x11   :  { %s1587_s29 = scalar_lea.vmem %s76_s26, 4096  ;;  %p1592_p6 = scmp.lt.s32.totalorder %s76_s26, %s76_s26 }
  0x12   :  { %p1588_p5 = scmp.ne.s32.totalorder %s76_s26, %s1587_s29  ;;  %p1593_p7 = scmp.lt.s32.totalorder %s1587_s29, %s1587_s29 }
  0x14   :  { %p1594_p8 = por %p1593_p7, %p1592_p6 }
  0x16   :  { %p1595_p9 = pnand %p1594_p8, %p1588_p5 }
  0x18   :  { %1598 = shalt.err (!%p1595_p9)
}
  0x19   :  { %81 = dma.hbm_to_vmem [thread:$0]  %s1888_s9, 4096, %s76_s26, [#allocation9], %s1688_s21, %s1688_s21, %s1689_s22  }
  0x1a   :  { %s1607_s1 = scalar_lea.vmem %s31_s28, 64  ;;  %p1612_p11 = scmp.lt.s32.totalorder %s31_s28, %s31_s28 }
  0x1b   :  { %p1608_p10 = scmp.ne.s32.totalorder %s31_s28, %s1607_s1  ;;  %p1613_p12 = scmp.lt.s32.totalorder %s1607_s1, %s1607_s1 }
  0x1d   :  { %p1614_p13 = por %p1613_p12, %p1612_p11 }
  0x1f   :  { %p1615_p0 = pnand %p1614_p13, %p1608_p10 }
  0x21   :  { %1618 = shalt.err (!%p1615_p0)
}
  0x22   :  { %33 = dma.hbm_to_vmem [thread:$0]  %s1879_s0, 64, %s31_s28, [#allocation3]  }
  0x23   :  { %s1692_s19 = smov [#allocation7]   ;;  %s1693_s23 = smov [#allocation10]  }
  0x24   :  { %s57_s20 = sshll.u32 %s1692_s19, 4  ;;  %s93_s24 = sshll.u32 %s1693_s23, 4  ;;  %s58_s20 = int_to_ptr.vmem [resolvable:$true] %s57_s20  ;;  %s94_s24 = int_to_ptr.vmem [resolvable:$true] %s93_s24 }
  0x25   :  { %s1627_s25 = scalar_lea.vmem %s58_s20, 4096  ;;  %p1632_p2 = scmp.lt.s32.totalorder %s58_s20, %s58_s20 }
  0x26   :  { %p1628_p1 = scmp.ne.s32.totalorder %s58_s20, %s1627_s25  ;;  %p1633_p3 = scmp.lt.s32.totalorder %s1627_s25, %s1627_s25 }
  0x28   :  { %p1634_p4 = por %p1633_p3, %p1632_p2 }
  0x2a   :  { %p1635_p5 = pnand %p1634_p4, %p1628_p1 }
  0x2c   :  { %1638 = shalt.err (!%p1635_p5)
}
  0x2d   :  { %63 = dma.hbm_to_vmem [thread:$0]  %s1884_s5, 4096, %s58_s20, [#allocation6], %s1688_s21, %s1688_s21, %s1689_s22  }
  0x2e   :  { %s1647_s0 = scalar_lea.vmem %s94_s24, 2048  ;;  %p1652_p7 = scmp.lt.s32.totalorder %s94_s24, %s94_s24 }
  0x2f   :  { %p1648_p6 = scmp.ne.s32.totalorder %s94_s24, %s1647_s0  ;;  %p1653_p8 = scmp.lt.s32.totalorder %s1647_s0, %s1647_s0 }
  0x31   :  { %p1654_p9 = por %p1653_p8, %p1652_p7 }
  0x33   :  { %p1655_p10 = pnand %p1654_p9, %p1648_p6 }
  0x35   :  { %1658 = shalt.err (!%p1655_p10)
}
  0x36   :  { %s1694_s27 = smov 64   ;;  %s1695_s28 = smov 4  }
  0x37   :  { %99 = dma.hbm_to_vmem [thread:$0]  %s1892_s13, 2048, %s94_s24, [#allocation9], %s1694_s27, %s1694_s27, %s1695_s28  }
  0x38   :  { %1679 = dma.done.wait [#allocation3], 64  }
  0x39   :  { %1680 = vsyncadd [#allocation3], 4294967232 }
  0x3a   :  { %1681 = dma.done.wait [#allocation6], 6144  }
  0x3b   :  { %1682 = vsyncadd [#allocation6], 4294961152 }
  0x3c   :  { %1683 = dma.done.wait [#allocation9], 6144  }
  0x3d   :  { %1684 = vsyncadd [#allocation9], 4294961152  ;;  %v1696_v0 = vmov 0   ;;  %v1411_v1 = vld [vmem:[#allocation5 + $0x74] ss:$8 sps:$4 sm:$0xff]   ;;  %v137_v50 = vlaneseq }
  0x3e   :  { %259 = vmatprep.mubr.bf16.mxu0 %v1696_v0  ;;  %v1413_v2 = vld [vmem:[#allocation5 + $0x70] ss:$8 sps:$4 sm:$0xff]   ;;  %227 = vmatprep.subr.bf16.mxu0 %v1411_v1  ;;  %v1414_v3 = vld [vmem:[#allocation5 + $0x64] ss:$8 sps:$4 sm:$0xff]   ;;  %v1416_v4 = vld [vmem:[#allocation5 + $0x60] ss:$8 sps:$4 sm:$0xff]  }
  0x3f   :  { %228 = vmatpush1.bf16.msra.mxu0 %v1413_v2  ;;  %v1417_v5 = vld [vmem:[#allocation5 + $0x54] ss:$8 sps:$4 sm:$0xff]   ;;  %v1419_v6 = vld [vmem:[#allocation5 + $0x50] ss:$8 sps:$4 sm:$0xff]   ;;  %v1420_v7 = vld [vmem:[#allocation5 + $0x44] ss:$8 sps:$4 sm:$0xff]  }
  0x40   :  { %229 = vmatprep.subr.bf16.mxu0 %v1414_v3  ;;  %v1422_v8 = vld [vmem:[#allocation5 + $0x40] ss:$8 sps:$4 sm:$0xff]   ;;  %v1423_v9 = vld [vmem:[#allocation5 + $0x34] ss:$8 sps:$4 sm:$0xff]   ;;  %v1425_v10 = vld [vmem:[#allocation5 + $0x30] ss:$8 sps:$4 sm:$0xff]  }
  0x41   :  { %v1426_v11 = vld [vmem:[#allocation5 + $0x24] ss:$8 sps:$4 sm:$0xff]   ;;  %v1428_v12 = vld [vmem:[#allocation5 + $0x20] ss:$8 sps:$4 sm:$0xff]   ;;  %v1429_v13 = vld [vmem:[#allocation5 + $0x14] ss:$8 sps:$4 sm:$0xff]  }
  0x42   :  { %v1431_v14 = vld [vmem:[#allocation5 + $0x10] ss:$8 sps:$4 sm:$0xff]   ;;  %v1432_v15 = vld [vmem:[#allocation5 + $0x4] ss:$8 sps:$4 sm:$0xff]   ;;  %v1434_v16 = vld [vmem:[#allocation5] ss:$8 sps:$4 sm:$0xff]  }
  0x43   :  { %230 = vmatpush1.bf16.msra.mxu0 %v1416_v4  ;;  %v118_v17 = vld [vmem:[#allocation2] sm:$0xf]  ;;  %v1437_v19 = vld [vmem:[#allocation7 + $0x70] ss:$8 sps:$4 sm:$0xff]   ;;  %v1438_v20 = vld [vmem:[#allocation7 + $0x64] ss:$8 sps:$4 sm:$0xff]  }
  0x44   :  { %231 = vmatprep.subr.bf16.mxu0 %v1417_v5  ;;  %v1435_v18 = vld [vmem:[#allocation7 + $0x74] ss:$8 sps:$4 sm:$0xff]   ;;  %v1440_v21 = vld [vmem:[#allocation7 + $0x60] ss:$8 sps:$4 sm:$0xff]   ;;  %v1443_v23 = vld [vmem:[#allocation7 + $0x50] ss:$8 sps:$4 sm:$0xff]  }
  0x45   :  { %583 = vmatprep.subr.bf16.mxu1 %v1435_v18  ;;  %v1441_v22 = vld [vmem:[#allocation7 + $0x54] ss:$8 sps:$4 sm:$0xff]   ;;  %v1444_v24 = vld [vmem:[#allocation7 + $0x44] ss:$8 sps:$4 sm:$0xff]   ;;  %v1446_v25 = vld [vmem:[#allocation7 + $0x40] ss:$8 sps:$4 sm:$0xff]  }
  0x46   :  { %584 = vmatpush1.bf16.msra.mxu1 %v1437_v19  ;;  %v1447_v26 = vld [vmem:[#allocation7 + $0x34] ss:$8 sps:$4 sm:$0xff]   ;;  %v1449_v27 = vld [vmem:[#allocation7 + $0x30] ss:$8 sps:$4 sm:$0xff]   ;;  %v1450_v28 = vld [vmem:[#allocation7 + $0x24] ss:$8 sps:$4 sm:$0xff]  }
  0x47   :  { %232 = vmatpush1.bf16.msra.mxu0 %v1419_v6  ;;  %585 = vmatprep.subr.bf16.mxu1 %v1438_v20  ;;  %v1452_v29 = vld [vmem:[#allocation7 + $0x20] ss:$8 sps:$4 sm:$0xff]   ;;  %v1453_v30 = vld [vmem:[#allocation7 + $0x14] ss:$8 sps:$4 sm:$0xff]   ;;  %v1455_v31 = vld [vmem:[#allocation7 + $0x10] ss:$8 sps:$4 sm:$0xff]  }
  0x48   :  { %233 = vmatprep.subr.bf16.mxu0 %v1420_v7  ;;  %v1456_v32 = vld [vmem:[#allocation7 + $0x4] ss:$8 sps:$4 sm:$0xff]   ;;  %v1458_v33 = vld [vmem:[#allocation7] ss:$8 sps:$4 sm:$0xff]   ;;  %v1459_v34 = vld [vmem:[#allocation7 + $0xf4] ss:$8 sps:$4 sm:$0xff]  }
  0x49   :  { %v1461_v35 = vld [vmem:[#allocation7 + $0xf0] ss:$8 sps:$4 sm:$0xff]   ;;  %v1462_v36 = vld [vmem:[#allocation7 + $0xe4] ss:$8 sps:$4 sm:$0xff]   ;;  %v1464_v37 = vld [vmem:[#allocation7 + $0xe0] ss:$8 sps:$4 sm:$0xff]  }
  0x4a   :  { %586 = vmatpush1.bf16.msra.mxu1 %v1440_v21  ;;  %v1465_v38 = vld [vmem:[#allocation7 + $0xd4] ss:$8 sps:$4 sm:$0xff]   ;;  %v1467_v39 = vld [vmem:[#allocation7 + $0xd0] ss:$8 sps:$4 sm:$0xff]   ;;  %v1468_v40 = vld [vmem:[#allocation7 + $0xc4] ss:$8 sps:$4 sm:$0xff]  }
  0x4b   :  { %234 = vmatpush1.bf16.msra.mxu0 %v1422_v8  ;;  %587 = vmatprep.subr.bf16.mxu1 %v1441_v22  ;;  %v1470_v41 = vld [vmem:[#allocation7 + $0xc0] ss:$8 sps:$4 sm:$0xff]   ;;  %v1471_v42 = vld [vmem:[#allocation7 + $0xb4] ss:$8 sps:$4 sm:$0xff]   ;;  %v1473_v43 = vld [vmem:[#allocation7 + $0xb0] ss:$8 sps:$4 sm:$0xff]  }
  0x4c   :  { %235 = vmatprep.subr.bf16.mxu0 %v1423_v9  ;;  %v1474_v44 = vld [vmem:[#allocation7 + $0xa4] ss:$8 sps:$4 sm:$0xff]   ;;  %v1476_v45 = vld [vmem:[#allocation7 + $0xa0] ss:$8 sps:$4 sm:$0xff]   ;;  %v1477_v46 = vld [vmem:[#allocation7 + $0x94] ss:$8 sps:$4 sm:$0xff]  }
  0x4d   :  { %v1479_v47 = vld [vmem:[#allocation7 + $0x90] ss:$8 sps:$4 sm:$0xff]   ;;  %v1480_v48 = vld [vmem:[#allocation7 + $0x84] ss:$8 sps:$4 sm:$0xff]   ;;  %v1482_v49 = vld [vmem:[#allocation7 + $0x80] ss:$8 sps:$4 sm:$0xff]  }
  0x4e   :  { %588 = vmatpush1.bf16.msra.mxu1 %v1443_v23  ;;  %v138_v51 = vshrl.u32 %v137_v50, 7  ;;  %v135_v53 = vld [vmem:[%s1881_s2] sm:$0x3] }
  0x4f   :  { %236 = vmatpush1.bf16.msra.mxu0 %v1425_v10  ;;  %589 = vmatprep.subr.bf16.mxu1 %v1444_v24 }
  0x50   :  { %237 = vmatprep.subr.bf16.mxu0 %v1426_v11  ;;  %v1803_v52 = vsub.s32 0, %v138_v51  ;;  %v1808_v54 = vsub.s32 1, %v138_v51 }
  0x52   :  { %590 = vmatpush1.bf16.msra.mxu1 %v1446_v25  ;;  %v140_v55 = vrot.slane %v135_v53, %v1803_v52  ;;  %v144_v56 = vrot.slane %v135_v53, %v1808_v54  ;;  %v327_v53 = vld [vmem:[%s1883_s4] sm:$0x3] }
  0x53   :  { %238 = vmatpush1.bf16.msra.mxu0 %v1428_v12  ;;  %591 = vmatprep.subr.bf16.mxu1 %v1447_v26 }
  0x54   :  { %239 = vmatprep.subr.bf16.mxu0 %v1429_v13 }
  0x56   :  { %592 = vmatpush1.bf16.msra.mxu1 %v1449_v27 }
  0x57   :  { %240 = vmatpush1.bf16.msra.mxu0 %v1431_v14  ;;  %593 = vmatprep.subr.bf16.mxu1 %v1450_v28 }
  0x58   :  { %241 = vmatprep.subr.bf16.mxu0 %v1432_v15 }
  0x5a   :  { %594 = vmatpush1.bf16.msra.mxu1 %v1452_v29 }
  0x5b   :  { %242 = vmatpush1.bf16.msra.mxu0 %v1434_v16  ;;  %595 = vmatprep.subr.bf16.mxu1 %v1453_v30 }
  0x5e   :  { %260 = vmatmul.mubr.bf16.vlgmr.msra.gmra.mxu0 %v118_v17  ;;  %596 = vmatpush1.bf16.msra.mxu1 %v1455_v31 }
  0x5f   :  { %597 = vmatprep.subr.bf16.mxu1 %v1456_v32 }
  0x62   :  { %598 = vmatpush1.bf16.msra.mxu1 %v1458_v33 }
  0x63   :  { %599 = vmatprep.subr.bf16.mxu1 %v1459_v34 }
  0x66   :  { %600 = vmatpush2.bf16.msra.mxu1 %v1461_v35  ;;  %v1697_v35 = vmov 1966171168  }
  0x67   :  { %601 = vmatprep.subr.bf16.mxu1 %v1462_v36  ;;  %v312_v36 = vunpack.c.l.s4 %v1697_v35  ;;  %v411_v35 = vld [vmem:[%s1885_s6] sm:$0x3] }
  0x6a   :  { %602 = vmatpush2.bf16.msra.mxu1 %v1464_v37  ;;  %v313_v37 = vunpack.c.0.s8 %v312_v36  ;;  %v416_v36 = vrot.slane %v411_v35, %v1803_v52 }
  0x6b   :  { %603 = vmatprep.subr.bf16.mxu1 %v1465_v38 }
  0x6e   :  { %604 = vmatpush2.bf16.msra.mxu1 %v1467_v39  ;;  %v1818_v39 = vsub.s32 %v313_v37, %v138_v51  ;;  %v420_v37 = vrot.slane %v411_v35, %v1808_v54 }
  0x6f   :  { %605 = vmatprep.subr.bf16.mxu1 %v1468_v40 }
  0x72   :  { %606 = vmatpush2.bf16.msra.mxu1 %v1470_v41 }
  0x73   :  { %607 = vmatprep.subr.bf16.mxu1 %v1471_v42 }
  0x76   :  { %608 = vmatpush2.bf16.msra.mxu1 %v1473_v43  ;;  %v303_v43 = vld [vmem:[%s1882_s3] sm:$0x3] }
  0x77   :  { %609 = vmatprep.subr.bf16.mxu1 %v1474_v44 }
  0x7a   :  { %610 = vmatpush2.bf16.msra.mxu1 %v1476_v45 }
  0x7b   :  { %611 = vmatprep.subr.bf16.mxu1 %v1477_v46 }
  0x7e   :  { %612 = vmatpush2.bf16.msra.mxu1 %v1479_v47 }
  0x7f   :  { %613 = vmatprep.subr.bf16.mxu1 %v1480_v48 }
  0x82   :  { %614 = vmatpush2.bf16.msra.mxu1 %v1482_v49 }
 0x11e   :  { %v261_v57 = vpop.f32.mrf.mxu0 }
 0x11f   :  { %v1812_v58 = vadd.f32 %v261_v57, %v140_v55 }
 0x120   :  { %v263_v59 = vpop.f32.mrf.mxu0 }
 0x121   :  { %v268_v60 = vrot.slane %v1812_v58, 4  ;;  %v283_v61 = vmul.f32 %v1812_v58, %v1812_v58  ;;  %v264_v62 = vadd.f32 %v263_v59, %v144_v56 }
 0x122   :  { %v265_v63 = vpop.f32.mrf.mxu0 }
 0x123   :  { %v269_v0 = vadd.f32 %v268_v60, %v1812_v58  ;;  %v285_v1 = vrot.slane %v283_v61, 4  ;;  %v274_v2 = vrot.slane %v264_v62, 4  ;;  %v284_v3 = vmul.f32 %v264_v62, %v264_v62 }
 0x124   :  { %v266_v4 = vpop.f32.mrf.mxu0 }
 0x125   :  { %v270_v5 = vrot.slane %v269_v0, 2  ;;  %v286_v6 = vadd.f32 %v285_v1, %v283_v61  ;;  %v275_v7 = vadd.f32 %v274_v2, %v264_v62  ;;  %v291_v8 = vrot.slane %v284_v3, 4 }
 0x127   :  { %v271_v9 = vadd.f32 %v270_v5, %v269_v0  ;;  %v287_v10 = vrot.slane %v286_v6, 2  ;;  %v276_v11 = vrot.slane %v275_v7, 2  ;;  %v292_v12 = vadd.f32 %v291_v8, %v284_v3  ;;  %v1485_v5 = vld [vmem:[#allocation8 + $0x74] ss:$8 sps:$4 sm:$0xff]  }
 0x128   :  { %938 = vmatprep.subr.bf16.mxu0 %v1485_v5  ;;  %v1491_v8 = vld [vmem:[#allocation8 + $0x54] ss:$8 sps:$4 sm:$0xff]  }
 0x129   :  { %v272_v13 = vrot.slane %v271_v9, 1  ;;  %v288_v14 = vadd.f32 %v287_v10, %v286_v6  ;;  %v277_v15 = vadd.f32 %v276_v11, %v275_v7  ;;  %v293_v16 = vrot.slane %v292_v12, 2  ;;  %v1483_v6 = vld [vmem:[#allocation8 + $0x70] ss:$8 sps:$4 sm:$0xff]   ;;  %v1488_v7 = vld [vmem:[#allocation8 + $0x64] ss:$8 sps:$4 sm:$0xff]  }
 0x12a   :  { %939 = vmatpush1.bf16.msra.mxu0 %v1483_v6  ;;  %v1492_v10 = vld [vmem:[#allocation8 + $0x40] ss:$8 sps:$4 sm:$0xff]   ;;  %v1497_v11 = vld [vmem:[#allocation8 + $0x34] ss:$8 sps:$4 sm:$0xff]  }
 0x12b   :  { %v273_v17 = vadd.f32 %v272_v13, %v271_v9  ;;  %v289_v18 = vrot.slane %v288_v14, 1  ;;  %v294_v19 = vadd.f32 %v293_v16, %v292_v12  ;;  %v278_v20 = vrot.slane %v277_v15, 1  ;;  %940 = vmatprep.subr.bf16.mxu0 %v1488_v7  ;;  %v1494_v9 = vld [vmem:[#allocation8 + $0x44] ss:$8 sps:$4 sm:$0xff]   ;;  %v1495_v12 = vld [vmem:[#allocation8 + $0x30] ss:$8 sps:$4 sm:$0xff]  }
 0x12c   :  { %v1500_v13 = vld [vmem:[#allocation8 + $0x24] ss:$8 sps:$4 sm:$0xff]   ;;  %v1501_v16 = vld [vmem:[#allocation8 + $0x10] ss:$8 sps:$4 sm:$0xff]  }
 0x12d   :  { %v290_v21 = vadd.f32 %v289_v18, %v288_v14  ;;  %v295_v22 = vrot.slane %v294_v19, 1  ;;  %v279_v23 = vadd.f32 %v278_v20, %v277_v15  ;;  %v281_v24 = vmul.f32 0.125, %v273_v17  ;;  %v1498_v14 = vld [vmem:[#allocation8 + $0x20] ss:$8 sps:$4 sm:$0xff]   ;;  %v1503_v15 = vld [vmem:[#allocation8 + $0x14] ss:$8 sps:$4 sm:$0xff]  }
 0x12e   :  { %v1506_v17 = vld [vmem:[#allocation8 + $0x4] ss:$8 sps:$4 sm:$0xff]   ;;  %v1504_v18 = vld [vmem:[#allocation8] ss:$8 sps:$4 sm:$0xff]   ;;  %v1507_v20 = vld [vmem:[#allocation8 + $0xf0] ss:$8 sps:$4 sm:$0xff]  }
 0x12f   :  { %v297_v25 = vmul.f32 0.125, %v290_v21  ;;  %v296_v26 = vadd.f32 %v295_v22, %v294_v19  ;;  %v282_v27 = vmul.f32 0.125, %v279_v23  ;;  %v299_v28 = vmul.f32 %v281_v24, %v281_v24  ;;  %v1509_v19 = vld [vmem:[#allocation8 + $0xf4] ss:$8 sps:$4 sm:$0xff]   ;;  %v1512_v21 = vld [vmem:[#allocation8 + $0xe4] ss:$8 sps:$4 sm:$0xff]  }
 0x130   :  { %v1510_v22 = vld [vmem:[#allocation8 + $0xe0] ss:$8 sps:$4 sm:$0xff]   ;;  %v1515_v23 = vld [vmem:[#allocation8 + $0xd4] ss:$8 sps:$4 sm:$0xff]  }
 0x131   :  { %v298_v29 = vmul.f32 0.125, %v296_v26  ;;  %v300_v30 = vmul.f32 %v282_v27, %v282_v27  ;;  %v301_v31 = vsub.f32 %v297_v25, %v299_v28  ;;  %v1518_v25 = vld [vmem:[#allocation8 + $0xc4] ss:$8 sps:$4 sm:$0xff]   ;;  %v1516_v26 = vld [vmem:[#allocation8 + $0xc0] ss:$8 sps:$4 sm:$0xff]  }
 0x132   :  { %v1519_v28 = vld [vmem:[#allocation8 + $0xb0] ss:$8 sps:$4 sm:$0xff]  }
 0x133   :  { %v302_v32 = vsub.f32 %v298_v29, %v300_v30  ;;  %v304_v33 = vadd.f32 1e-05, %v301_v31  ;;  %v1524_v29 = vld [vmem:[#allocation8 + $0xa4] ss:$8 sps:$4 sm:$0xff]   ;;  %v1522_v30 = vld [vmem:[#allocation8 + $0xa0] ss:$8 sps:$4 sm:$0xff]  }
 0x134   :  { %v1527_v31 = vld [vmem:[#allocation8 + $0x94] ss:$8 sps:$4 sm:$0xff]  }
 0x135   :  { %v305_v34 = vadd.f32 1e-05, %v302_v32  ;;  %1547 = vrsqrt.f32 %v304_v33  ;;  %v1525_v32 = vld [vmem:[#allocation8 + $0x90] ss:$8 sps:$4 sm:$0xff]   ;;  %v1530_v33 = vld [vmem:[#allocation8 + $0x84] ss:$8 sps:$4 sm:$0xff]  }
 0x137   :  { %1549 = vrsqrt.f32 %v305_v34  ;;  %v1528_v34 = vld [vmem:[#allocation8 + $0x80] ss:$8 sps:$4 sm:$0xff]  }
 0x142   :  { %v1548_v38 = vpop.eup %1547 }
 0x144   :  { %v1550_v40 = vpop.eup %1549 }
 0x145   :  { %v310_v41 = vcombine.low %v1548_v38, %v1550_v40 }
 0x147   :  { %v317_v42 = vrot.slane %v310_v41, %v1818_v39 }
 0x149   :  { %v324_v44 = vrot.slane %v317_v42, %v1818_v39 }
 0x14b   :  { %v326_v45 = vmul.f32 %v324_v44, %v303_v43 }
 0x14d   :  { %v332_v46 = vrot.slane %v326_v45, %v1803_v52  ;;  %v336_v47 = vrot.slane %v326_v45, %v1808_v54 }
 0x14f   :  { %v339_v48 = vmul.f32 %v332_v46, %v281_v24  ;;  %v340_v49 = vmul.f32 %v336_v47, %v282_v27  ;;  %v361_v57 = vmul.f32 %v336_v47, %v264_v62  ;;  %v360_v60 = vmul.f32 %v332_v46, %v1812_v58  ;;  %v1486_v62 = vld [vmem:[#allocation8 + $0x60] ss:$8 sps:$4 sm:$0xff]   ;;  %v1489_v58 = vld [vmem:[#allocation8 + $0x50] ss:$8 sps:$4 sm:$0xff]   ;;  %v1521_v27 = vld [vmem:[#allocation8 + $0xb4] ss:$8 sps:$4 sm:$0xff]  }
 0x150   :  { %941 = vmatpush1.bf16.msra.mxu0 %v1486_v62  ;;  %v1513_v24 = vld [vmem:[#allocation8 + $0xd0] ss:$8 sps:$4 sm:$0xff]  }
 0x151   :  { %v343_v50 = vcombine.low %v339_v48, %v340_v49  ;;  %942 = vmatprep.subr.bf16.mxu0 %v1491_v8 }
 0x153   :  { %v350_v51 = vrot.slane %v343_v50, %v1818_v39 }
 0x154   :  { %943 = vmatpush1.bf16.msra.mxu0 %v1489_v58 }
 0x155   :  { %v357_v55 = vrot.slane %v350_v51, %v1818_v39  ;;  %944 = vmatprep.subr.bf16.mxu0 %v1494_v9 }
 0x157   :  { %v359_v56 = vsub.f32 %v327_v53, %v357_v55 }
 0x158   :  { %945 = vmatpush1.bf16.msra.mxu0 %v1492_v10 }
 0x159   :  { %v370_v59 = vrot.slane %v359_v56, %v1808_v54  ;;  %v366_v61 = vrot.slane %v359_v56, %v1803_v52  ;;  %946 = vmatprep.subr.bf16.mxu0 %v1497_v11 }
 0x15b   :  { %v374_v63 = vadd.f32 %v370_v59, %v361_v57  ;;  %v373_v0 = vadd.f32 %v366_v61, %v360_v60 }
 0x15c   :  { %947 = vmatpush1.bf16.msra.mxu0 %v1495_v12 }
 0x15d   :  { %v376_v1 = vmax.f32 %v374_v63, 0.0  ;;  %v375_v2 = vmax.f32 %v373_v0, 0.0  ;;  %948 = vmatprep.subr.bf16.mxu0 %v1500_v13 }
 0x15f   :  { %v378_v3 = vpack.c.bf16 %v376_v1, %v376_v1  ;;  %v377_v4 = vpack.c.bf16 %v375_v2, %v375_v2 }
 0x160   :  { %949 = vmatpush1.bf16.msra.mxu0 %v1498_v14 }
 0x161   :  { %615 = vmatprep.mubr.bf16.mxu1 %v378_v3  ;;  %950 = vmatprep.subr.bf16.mxu0 %v1503_v15 }
 0x162   :  { %616 = vmatmul.mubr.bf16.vlgmr.msra.gmra.mxu1 %v377_v4 }
 0x164   :  { %951 = vmatpush1.bf16.msra.mxu0 %v1501_v16 }
 0x165   :  { %952 = vmatprep.subr.bf16.mxu0 %v1506_v17 }
 0x168   :  { %953 = vmatpush1.bf16.msra.mxu0 %v1504_v18 }
 0x169   :  { %954 = vmatprep.subr.bf16.mxu0 %v1509_v19 }
 0x16c   :  { %955 = vmatpush2.bf16.msra.mxu0 %v1507_v20 }
 0x16d   :  { %956 = vmatprep.subr.bf16.mxu0 %v1512_v21 }
 0x170   :  { %957 = vmatpush2.bf16.msra.mxu0 %v1510_v22 }
 0x171   :  { %958 = vmatprep.subr.bf16.mxu0 %v1515_v23  ;;  %v658_v23 = vld [vmem:[%s1886_s7] sm:$0x3] }
 0x174   :  { %959 = vmatpush2.bf16.msra.mxu0 %v1513_v24 }
 0x175   :  { %960 = vmatprep.subr.bf16.mxu0 %v1518_v25 }
 0x178   :  { %961 = vmatpush2.bf16.msra.mxu0 %v1516_v26 }
 0x179   :  { %962 = vmatprep.subr.bf16.mxu0 %v1521_v27 }
 0x17c   :  { %963 = vmatpush2.bf16.msra.mxu0 %v1519_v28 }
 0x17d   :  { %964 = vmatprep.subr.bf16.mxu0 %v1524_v29 }
 0x180   :  { %965 = vmatpush2.bf16.msra.mxu0 %v1522_v30 }
 0x181   :  { %966 = vmatprep.subr.bf16.mxu0 %v1527_v31 }
 0x184   :  { %967 = vmatpush2.bf16.msra.mxu0 %v1525_v32  ;;  %v682_v32 = vld [vmem:[%s1887_s8] sm:$0x3] }
 0x185   :  { %968 = vmatprep.subr.bf16.mxu0 %v1530_v33 }
 0x188   :  { %969 = vmatpush2.bf16.msra.mxu0 %v1528_v34 }
 0x222   :  { %v617_v38 = vpop.f32.mrf.mxu1 }
 0x223   :  { %v618_v40 = vadd.f32 %v617_v38, %v416_v36 }
 0x224   :  { %v619_v41 = vpop.f32.mrf.mxu1 }
 0x225   :  { %v624_v42 = vrot.slane %v618_v40, 4  ;;  %v638_v43 = vmul.f32 %v618_v40, %v618_v40  ;;  %v620_v44 = vadd.f32 %v619_v41, %v420_v37 }
 0x226   :  { %v621_v45 = vpop.f32.mrf.mxu1 }
 0x227   :  { %v625_v46 = vadd.f32 %v624_v42, %v618_v40  ;;  %v640_v47 = vrot.slane %v638_v43, 4  ;;  %v630_v48 = vrot.slane %v620_v44, 4  ;;  %v639_v49 = vmul.f32 %v620_v44, %v620_v44 }
 0x228   :  { %v622_v50 = vpop.f32.mrf.mxu1 }
 0x229   :  { %v626_v51 = vrot.slane %v625_v46, 2  ;;  %v641_v53 = vadd.f32 %v640_v47, %v638_v43  ;;  %v631_v55 = vadd.f32 %v630_v48, %v620_v44  ;;  %v646_v56 = vrot.slane %v639_v49, 4  ;;  %v1531_v48 = vld [vmem:[#allocation10 + $0x78] sm:$0xff]   ;;  %v1533_v50 = vld [vmem:[#allocation10 + $0x70] sm:$0xff]  }
 0x22a   :  { %1377 = vmatprep.subr.bf16.mxu1 %v1531_v48 }
 0x22b   :  { %v627_v57 = vadd.f32 %v626_v51, %v625_v46  ;;  %v642_v59 = vrot.slane %v641_v53, 2  ;;  %v632_v60 = vrot.slane %v631_v55, 2  ;;  %v647_v61 = vadd.f32 %v646_v56, %v639_v49  ;;  %v1532_v49 = vld [vmem:[#allocation10 + $0x38] sm:$0xff]   ;;  %v1534_v51 = vld [vmem:[#allocation10 + $0x30] sm:$0xff]  }
 0x22c   :  { %1378 = vmatpush3.bf16.msra.mxu1 %v1532_v49  ;;  %v1539_v56 = vld [vmem:[#allocation10 + $0x58] sm:$0xff]  }
 0x22d   :  { %v628_v63 = vrot.slane %v627_v57, 1  ;;  %v643_v0 = vadd.f32 %v642_v59, %v641_v53  ;;  %v633_v1 = vadd.f32 %v632_v60, %v631_v55  ;;  %v648_v2 = vrot.slane %v647_v61, 2  ;;  %1379 = vmatprep.subr.bf16.mxu1 %v1533_v50  ;;  %v1537_v53 = vld [vmem:[#allocation10 + $0x60] sm:$0xff]   ;;  %v1541_v59 = vld [vmem:[#allocation10 + $0x50] sm:$0xff]  }
 0x22e   :  { %v1538_v55 = vld [vmem:[#allocation10 + $0x20] sm:$0xff]   ;;  %v1542_v60 = vld [vmem:[#allocation10 + $0x10] sm:$0xff]  }
 0x22f   :  { %v629_v3 = vadd.f32 %v628_v63, %v627_v57  ;;  %v644_v4 = vrot.slane %v643_v0, 1  ;;  %v634_v5 = vrot.slane %v633_v1, 1  ;;  %v649_v6 = vadd.f32 %v648_v2, %v647_v61  ;;  %v1540_v57 = vld [vmem:[#allocation10 + $0x18] sm:$0xff]   ;;  %v1543_v61 = vld [vmem:[#allocation10 + $0x48] sm:$0xff]  }
 0x230   :  { %1380 = vmatpush3.bf16.msra.mxu1 %v1534_v51  ;;  %v1544_v63 = vld [vmem:[#allocation10 + $0x8] sm:$0xff]   ;;  %v766_v2 = vld [vmem:[%s1889_s10] sm:$0x3] }
 0x231   :  { %v636_v7 = vmul.f32 0.125, %v629_v3  ;;  %v645_v62 = vadd.f32 %v644_v4, %v643_v0  ;;  %v635_v8 = vadd.f32 %v634_v5, %v633_v1  ;;  %v650_v58 = vrot.slane %v649_v6, 1  ;;  %v1545_v0 = vld [vmem:[#allocation10 + $0x40] sm:$0xff]  }
 0x232   :  { %v1546_v1 = vld [vmem:[#allocation10] sm:$0xff]   ;;  %v771_v3 = vrot.slane %v766_v2, %v1803_v52  ;;  %v775_v4 = vrot.slane %v766_v2, %v1808_v54 }
 0x233   :  { %v652_v9 = vmul.f32 0.125, %v645_v62  ;;  %v654_v10 = vmul.f32 %v636_v7, %v636_v7  ;;  %v651_v11 = vadd.f32 %v650_v58, %v649_v6  ;;  %v637_v12 = vmul.f32 0.125, %v635_v8 }
 0x235   :  { %v656_v13 = vsub.f32 %v652_v9, %v654_v10  ;;  %v653_v14 = vmul.f32 0.125, %v651_v11  ;;  %v655_v15 = vmul.f32 %v637_v12, %v637_v12 }
 0x237   :  { %v659_v16 = vadd.f32 1e-05, %v656_v13  ;;  %v657_v17 = vsub.f32 %v653_v14, %v655_v15 }
 0x239   :  { %v660_v18 = vadd.f32 1e-05, %v657_v17  ;;  %1551 = vrsqrt.f32 %v659_v16 }
 0x23b   :  { %1553 = vrsqrt.f32 %v660_v18 }
 0x246   :  { %v1552_v19 = vpop.eup %1551 }
 0x248   :  { %v1554_v20 = vpop.eup %1553 }
 0x249   :  { %v665_v21 = vcombine.low %v1552_v19, %v1554_v20 }
 0x24b   :  { %v672_v22 = vrot.slane %v665_v21, %v1818_v39 }
 0x24d   :  { %v679_v24 = vrot.slane %v672_v22, %v1818_v39 }
 0x24f   :  { %v681_v25 = vmul.f32 %v679_v24, %v658_v23 }
 0x251   :  { %v687_v26 = vrot.slane %v681_v25, %v1803_v52  ;;  %v691_v27 = vrot.slane %v681_v25, %v1808_v54 }
 0x253   :  { %v694_v28 = vmul.f32 %v687_v26, %v636_v7  ;;  %v695_v29 = vmul.f32 %v691_v27, %v637_v12  ;;  %v716_v35 = vmul.f32 %v691_v27, %v620_v44  ;;  %v715_v37 = vmul.f32 %v687_v26, %v618_v40  ;;  %v1535_v44 = vld [vmem:[#allocation10 + $0x68] sm:$0xff]  }
 0x254   :  { %v1536_v40 = vld [vmem:[#allocation10 + $0x28] sm:$0xff]   ;;  %1381 = vmatprep.subr.bf16.mxu1 %v1535_v44  ;;  %v1013_v44 = vld [vmem:[%s1890_s11] sm:$0x3] }
 0x255   :  { %v698_v30 = vcombine.low %v694_v28, %v695_v29  ;;  %1382 = vmatpush3.bf16.msra.mxu1 %v1536_v40 }
 0x256   :  { %1383 = vmatprep.subr.bf16.mxu1 %v1537_v53 }
 0x257   :  { %v705_v31 = vrot.slane %v698_v30, %v1818_v39 }
 0x259   :  { %v712_v33 = vrot.slane %v705_v31, %v1818_v39  ;;  %1384 = vmatpush3.bf16.msra.mxu1 %v1538_v55 }
 0x25a   :  { %1385 = vmatprep.subr.bf16.mxu1 %v1539_v56 }
 0x25b   :  { %v714_v34 = vsub.f32 %v682_v32, %v712_v33 }
 0x25d   :  { %v725_v36 = vrot.slane %v714_v34, %v1808_v54  ;;  %v721_v38 = vrot.slane %v714_v34, %v1803_v52  ;;  %1386 = vmatpush3.bf16.msra.mxu1 %v1540_v57 }
 0x25e   :  { %1387 = vmatprep.subr.bf16.mxu1 %v1541_v59 }
 0x25f   :  { %v729_v41 = vadd.f32 %v725_v36, %v716_v35  ;;  %v728_v42 = vadd.f32 %v721_v38, %v715_v37 }
 0x261   :  { %v731_v43 = vmax.f32 %v729_v41, 0.0  ;;  %v730_v45 = vmax.f32 %v728_v42, 0.0  ;;  %1388 = vmatpush3.bf16.msra.mxu1 %v1542_v60 }
 0x262   :  { %1389 = vmatprep.subr.bf16.mxu1 %v1543_v61 }
 0x263   :  { %v733_v46 = vpack.c.bf16 %v731_v43, %v731_v43  ;;  %v732_v47 = vpack.c.bf16 %v730_v45, %v730_v45 }
 0x265   :  { %970 = vmatprep.mubr.bf16.mxu0 %v733_v46  ;;  %1390 = vmatpush3.bf16.msra.mxu1 %v1544_v63  ;;  %v1037_v63 = vld [vmem:[%s1891_s12] sm:$0x3]  ;;  %s1698_s12 = smov [#allocation11]  }
 0x266   :  { %971 = vmatmul.mubr.bf16.vlgmr.msra.gmra.mxu0 %v732_v47  ;;  %1391 = vmatprep.subr.bf16.mxu1 %v1545_v0  ;;  %s1269_s25 = sshll.u32 %s1698_s12, 4  ;;  %s1270_s25 = int_to_ptr.vmem [resolvable:$true] %s1269_s25 }
 0x267   :  { %s1659_s9 = scalar_lea.vmem %s1270_s25, 128  ;;  %p1664_p12 = scmp.lt.s32.totalorder %s1270_s25, %s1270_s25 }
 0x268   :  { %p1660_p11 = scmp.ne.s32.totalorder %s1270_s25, %s1659_s9  ;;  %p1665_p13 = scmp.lt.s32.totalorder %s1659_s9, %s1659_s9 }
 0x269   :  { %1392 = vmatpush3.bf16.msra.mxu1 %v1546_v1 }
 0x26a   :  { %p1666_p0 = por %p1665_p13, %p1664_p12 }
 0x26c   :  { %p1667_p1 = pnand %p1666_p0, %p1660_p11 }
 0x326   :  { %v972_v5 = vpop.f32.mrf.mxu0 }
 0x327   :  { %v973_v6 = vadd.f32 %v972_v5, %v771_v3 }
 0x328   :  { %v974_v7 = vpop.f32.mrf.mxu0 }
 0x329   :  { %v979_v62 = vrot.slane %v973_v6, 4  ;;  %v993_v8 = vmul.f32 %v973_v6, %v973_v6  ;;  %v975_v58 = vadd.f32 %v974_v7, %v775_v4 }
 0x32a   :  { %v976_v9 = vpop.f32.mrf.mxu0 }
 0x32b   :  { %v980_v10 = vadd.f32 %v979_v62, %v973_v6  ;;  %v995_v11 = vrot.slane %v993_v8, 4  ;;  %v985_v12 = vrot.slane %v975_v58, 4  ;;  %v994_v13 = vmul.f32 %v975_v58, %v975_v58 }
 0x32c   :  { %v977_v14 = vpop.f32.mrf.mxu0 }
 0x32d   :  { %v981_v15 = vrot.slane %v980_v10, 2  ;;  %v996_v16 = vadd.f32 %v995_v11, %v993_v8  ;;  %v986_v17 = vadd.f32 %v985_v12, %v975_v58  ;;  %v1001_v18 = vrot.slane %v994_v13, 4  ;;  %v1360_v11 = vld [vmem:[%s1893_s14] ss:$0 sm:$0xff] }
 0x32f   :  { %v982_v19 = vadd.f32 %v981_v15, %v980_v10  ;;  %v997_v20 = vrot.slane %v996_v16, 2  ;;  %v987_v21 = vrot.slane %v986_v17, 2  ;;  %v1002_v22 = vadd.f32 %v1001_v18, %v994_v13 }
 0x331   :  { %v983_v23 = vrot.slane %v982_v19, 1  ;;  %v998_v24 = vadd.f32 %v997_v20, %v996_v16  ;;  %v988_v25 = vadd.f32 %v987_v21, %v986_v17  ;;  %v1003_v26 = vrot.slane %v1002_v22, 2 }
 0x333   :  { %v984_v27 = vadd.f32 %v983_v23, %v982_v19  ;;  %v999_v28 = vrot.slane %v998_v24, 1  ;;  %v989_v29 = vrot.slane %v988_v25, 1  ;;  %v1004_v30 = vadd.f32 %v1003_v26, %v1002_v22 }
 0x335   :  { %v991_v31 = vmul.f32 0.125, %v984_v27  ;;  %v1000_v32 = vadd.f32 %v999_v28, %v998_v24  ;;  %v990_v33 = vadd.f32 %v989_v29, %v988_v25  ;;  %v1005_v34 = vrot.slane %v1004_v30, 1 }
 0x337   :  { %v1007_v35 = vmul.f32 0.125, %v1000_v32  ;;  %v1009_v36 = vmul.f32 %v991_v31, %v991_v31  ;;  %v1006_v37 = vadd.f32 %v1005_v34, %v1004_v30  ;;  %v992_v38 = vmul.f32 0.125, %v990_v33 }
 0x339   :  { %v1011_v41 = vsub.f32 %v1007_v35, %v1009_v36  ;;  %v1008_v42 = vmul.f32 0.125, %v1006_v37  ;;  %v1010_v43 = vmul.f32 %v992_v38, %v992_v38 }
 0x33b   :  { %v1014_v45 = vadd.f32 1e-05, %v1011_v41  ;;  %v1012_v46 = vsub.f32 %v1008_v42, %v1010_v43 }
 0x33d   :  { %v1015_v47 = vadd.f32 1e-05, %v1012_v46  ;;  %1555 = vrsqrt.f32 %v1014_v45 }
 0x33f   :  { %1557 = vrsqrt.f32 %v1015_v47 }
 0x34a   :  { %v1556_v48 = vpop.eup %1555 }
 0x34c   :  { %v1558_v49 = vpop.eup %1557 }
 0x34d   :  { %v1020_v50 = vcombine.low %v1556_v48, %v1558_v49 }
 0x34f   :  { %v1027_v51 = vrot.slane %v1020_v50, %v1818_v39 }
 0x351   :  { %v1034_v40 = vrot.slane %v1027_v51, %v1818_v39 }
 0x353   :  { %v1036_v53 = vmul.f32 %v1034_v40, %v1013_v44 }
 0x355   :  { %v1042_v55 = vrot.slane %v1036_v53, %v1803_v52  ;;  %v1046_v56 = vrot.slane %v1036_v53, %v1808_v54 }
 0x357   :  { %v1049_v57 = vmul.f32 %v1042_v55, %v991_v31  ;;  %v1050_v59 = vmul.f32 %v1046_v56, %v992_v38  ;;  %v1071_v2 = vmul.f32 %v1046_v56, %v975_v58  ;;  %v1070_v4 = vmul.f32 %v1042_v55, %v973_v6 }
 0x359   :  { %v1053_v60 = vcombine.low %v1049_v57, %v1050_v59 }
 0x35b   :  { %v1060_v61 = vrot.slane %v1053_v60, %v1818_v39 }
 0x35d   :  { %v1067_v0 = vrot.slane %v1060_v61, %v1818_v39 }
 0x35f   :  { %v1069_v1 = vsub.f32 %v1037_v63, %v1067_v0 }
 0x361   :  { %v1080_v3 = vrot.slane %v1069_v1, %v1808_v54  ;;  %v1076_v5 = vrot.slane %v1069_v1, %v1803_v52 }
 0x363   :  { %v1084_v7 = vadd.f32 %v1080_v3, %v1071_v2  ;;  %v1083_v62 = vadd.f32 %v1076_v5, %v1070_v4 }
 0x365   :  { %v1086_v8 = vpack.c.bf16 %v1084_v7, %v1084_v7  ;;  %v1085_v9 = vpack.c.bf16 %v1083_v62, %v1083_v62 }
 0x367   :  { %1254 = vmatprep.mubr.bf16.mxu1 %v1086_v8 }
 0x368   :  { %1255 = vmatmul.mubr.bf16.vlgmr.msra.gmra.mxu1 %v1085_v9 }
 0x428   :  { %v1393_v10 = vpop.f32.mrf.mxu1 }
 0x42a   :  { %v1394_v12 = vpop.f32.mrf.mxu1 }
 0x42b   :  { %v1395_v39 = vadd.f32 %v1394_v12, %v1393_v10 }
 0x42c   :  { %v1396_v58 = vpop.f32.mrf.mxu1 }
 0x42d   :  { %v1257_v54 = vadd.f32 %v1395_v39, %v1360_v11 }
 0x42e   :  { %v1397_v6 = vpop.f32.mrf.mxu1 }
 0x42f   :  { %1262 = vst [vmem:[#allocation11] sm:$0xff] %v1257_v54 }
 0x430   :  { %1670 = shalt.err (!%p1667_p1)
}
 0x431   :  { %1272 = dma.vmem_to_hbm [thread:$0]  %s1270_s25, 128, %s1894_s15, [#allocation4]  }
 0x432   :  { %1685 = dma.done.wait [#allocation4], 128  }
 0x433   :  { %1686 = vsyncadd [#allocation4], 4294967168 }
 0x434   :  { %1276 = vsyncpa [#allocation3], 1 }
 0x435   :  { %1277 = vsyncpa [#allocation6], 1 }
 0x436   :  { %1278 = vsyncpa [#allocation9], 1 }
 0x437   :  { %1279 = vsyncpa [#allocation4], 1 }

</bundles_post_ra>
